<compile_context>
chip_gen: v7x
topology: tpu7x:2x2x1
jax: 0.10.0
libtpu: 0.0.40
codegen_flags: <defaults>
</compile_context>

<pallas_src>
import math
import functools

import jax
import jax.numpy as jnp
from jax.experimental import pallas as pl
from jax.experimental.pallas import tpu as pltpu

TWO_PI = 2.0 * math.pi

# Deterministic, in-script "config" (mirrors the arnheim config dict).
CONFIG = dict(
    min_hue_deg=0.0,
    max_hue_deg=360.0,
    min_sat=0.5,
    max_sat=1.0,
    min_val=0.5,
    max_val=1.0,
)


def _round_up(x, m):
    return ((x + m - 1) // m) * m


def _hsv_colour_kernel(params_ref, img_ref, out_ref, *, hw):
    """Elementwise HSV->RGB colour transform on a fused slab of images.

    params_ref: VMEM (tile, 4)    pre-clamped [hue, sat, val, order] per image.
    img_ref:    VMEM (tile, 5*hw) flattened [h | s | v | alpha | order] slabs.
    out_ref:    VMEM (tile, 5*hw) output    [r | g | b | alpha | order].
    """
    f32 = jnp.float32
    prm = params_ref[...]                       # (tile, 4) float32

    # Per-row scalar columns, constant factors folded once (tiny (tile,1) ops).
    hue6 = prm[:, 0:1] * f32(6.0 / TWO_PI)      # hue * x / (2*pi) * 6
    sat = prm[:, 1:2]
    val = prm[:, 2:3]
    order = prm[:, 3:4]

    # Channel slices are static, 128-aligned lane ranges (hw % 128 == 0).
    # Upcast in VMEM so bf16 inputs stay narrow in HBM.
    h6 = img_ref[:, 0 * hw:1 * hw].astype(f32) * hue6
    s = img_ref[:, 1 * hw:2 * hw].astype(f32) * sat
    v = img_ref[:, 2 * hw:3 * hw].astype(f32) * val

    # kornia HsvToRgb (hue expected in [0, 2*pi]).
    hi = jnp.floor(h6) % 6.0
    f = (h6 % 6.0) - hi
    hii = hi.astype(jnp.int32)

    one = f32(1.0)
    pp = v * (one - s)
    qq = v * (one - f * s)
    tt = v * (one - (one - f) * s)

    def pick(c0, c1, c2, c3, c4, c5):
        return jnp.where(hii == 0, c0,
               jnp.where(hii == 1, c1,
               jnp.where(hii == 2, c2,
               jnp.where(hii == 3, c3,
               jnp.where(hii == 4, c4, c5)))))

    odt = out_ref.dtype
    out_ref[:, 0 * hw:1 * hw] = pick(v, qq, pp, pp, tt, v).astype(odt)
    out_ref[:, 1 * hw:2 * hw] = pick(tt, v, v, qq, pp, pp).astype(odt)
    out_ref[:, 2 * hw:3 * hw] = pick(pp, pp, tt, v, v, qq).astype(odt)
    # Alpha: the module's '_zeros' parameter is all-ones -> pure passthrough.
    out_ref[:, 3 * hw:4 * hw] = img_ref[:, 3 * hw:4 * hw]
    out_ref[:, 4 * hw:5 * hw] = (
        img_ref[:, 4 * hw:5 * hw].astype(f32) * order).astype(odt)


def population_colour_hsv_forward(image, hues, saturations, values, orders,
                                  config=CONFIG):
    """Pallas equivalent of PopulationColourHSVTransforms.forward.

    image: (P, N, 5, H, W); hues/saturations/values/orders: (P, N).
    """
    P, N, C, H, W = image.shape
    assert C == 5
    PN = P * N
    HW = H * W
    # Guard the lane-alignment assumption (perf cliff, not a numerics issue).
    assert HW % 128 == 0, (
        f"H*W (= {HW}) must be a multiple of 128 for the fused lane-dense "
        "layout; lane-pad the channel slabs for other shapes.")

    min_hue = config['min_hue_deg'] * math.pi / 180.0
    max_hue = config['max_hue_deg'] * math.pi / 180.0

    # _clamp() semantics, done once in the wrapper (O(P*N), negligible).
    hue_c = jnp.clip(hues.astype(jnp.float32), min_hue, max_hue)
    sat_c = jnp.clip(saturations.astype(jnp.float32),
                     float(config['min_sat']), float(config['max_sat']))
    val_c = jnp.clip(values.astype(jnp.float32),
                     float(config['min_val']), float(config['max_val']))
    ord_c = jnp.clip(orders.astype(jnp.float32), 0.0, 1.0)
    params = jnp.stack([hue_c, sat_c, val_c, ord_c], axis=-1).reshape(PN, 4)

    # Lane-dense fused layout; keep the caller's dtype (no extra HBM pass).
    img2d = image.reshape(PN, C * HW)
    out_dtype = image.dtype
    itemsize = jnp.dtype(out_dtype).itemsize

    # Generation-aware VMEM budget: half of physical, capped at 64 MiB
    # (v5e/v6e: 64 MiB; v7x with 64 MiB physical: 32 MiB).
    try:
        info = pltpu.get_tpu_info()
        vmem_cap = int(getattr(info, "vmem_capacity_bytes", 64 * 1024 * 1024))
    except Exception:
        vmem_cap = 64 * 1024 * 1024
    vmem_limit = min(vmem_cap // 2, 64 * 1024 * 1024)

    # Shape-aware tile: double-buffered in + out blocks plus ~8 full-slab
    # float32 intermediates from the elementwise chain.
    row_bytes = 2 * 2 * C * HW * itemsize + 8 * HW * 4
    tile = max(8, ((vmem_limit * 3 // 4) // row_bytes) // 8 * 8)
    # Keep >=4 grid steps so 2-TensorCore chips (v7x) can shard the grid.
    tile = min(tile, max(8, _round_up((PN + 3) // 4, 8)))
    if tile >= PN:
        tile = PN                       # block dim == full array dim is legal
    grid = (pl.cdiv(PN, tile),)         # ragged tail handled by Pallas masking

    kernel = functools.partial(_hsv_colour_kernel, hw=HW)

    out2d = pl.pallas_call(
        kernel,
        out_shape=jax.ShapeDtypeStruct((PN, C * HW), out_dtype),
        grid=grid,
        in_specs=[
            pl.BlockSpec((tile, 4), lambda i: (i, 0)),
            pl.BlockSpec((tile, C * HW), lambda i: (i, 0)),
        ],
        out_specs=pl.BlockSpec((tile, C * HW), lambda i: (i, 0)),
        compiler_params=pltpu.CompilerParams(
            dimension_semantics=("parallel",),
            vmem_limit_bytes=int(vmem_limit)),
    )(params, img2d)

    return out2d.reshape(P, N, C, H, W)


def _reference(image, hues, saturations, values, orders, config=CONFIG):
    """Pure-JAX reference reproducing the PyTorch forward (kornia HsvToRgb)."""
    min_hue = config['min_hue_deg'] * math.pi / 180.0
    max_hue = config['max_hue_deg'] * math.pi / 180.0
    hue = jnp.clip(hues, min_hue, max_hue)[:, :, None, None, None]
    sat = jnp.clip(saturations, config['min_sat'],
                   config['max_sat'])[:, :, None, None, None]
    val = jnp.clip(values, config['min_val'],
                   config['max_val'])[:, :, None, None, None]
    ordr = jnp.clip(orders, 0.0, 1.0)[:, :, None, None, None]
    ones = jnp.ones_like(hue)
    colours = jnp.concatenate([hue, sat, val, ones, ordr], axis=2)
    hsv_image = colours * image.astype(jnp.float32)
    h = hsv_image[:, :, 0] / TWO_PI
    s = hsv_image[:, :, 1]
    v = hsv_image[:, :, 2]
    h6 = h * 6.0
    hi = jnp.floor(h6) % 6.0
    f = (h6 % 6.0) - hi
    pp = v * (1.0 - s)
    qq = v * (1.0 - f * s)
    tt = v * (1.0 - (1.0 - f) * s)
    hii = hi.astype(jnp.int32)

    def pick(cands):
        out = cands[-1]
        for i in range(4, -1, -1):
            out = jnp.where(hii == i, cands[i], out)
        return out

    r = pick([v, qq, pp, pp, tt, v])
    g = pick([tt, v, v, qq, pp, pp])
    b = pick([pp, pp, tt, v, v, qq])
    rgb = jnp.stack([r, g, b], axis=2)
    return jnp.concatenate([rgb, hsv_image[:, :, 3:]], axis=2)


if __name__ == "__main__":
    pop_size, num_patches, H, W = 2, 3, 16, 16

    key = jax.random.PRNGKey(0)
    k_img, k_h, k_s, k_v, k_o = jax.random.split(key, 5)

    # Parameter init mirrors the module's __init__ (rand * coeff), deterministic.
    min_hue = CONFIG['min_hue_deg'] * math.pi / 180.0
    max_hue = CONFIG['max_hue_deg'] * math.pi / 180.0
    coeff_hue = 0.5 * (max_hue - min_hue) + min_hue
    coeff_sat = 0.5 * (CONFIG['max_sat'] - CONFIG['min_sat']) + CONFIG['min_sat']
    coeff_val = 0.5 * (CONFIG['max_val'] - CONFIG['min_val']) + CONFIG['min_val']

    hues = jax.random.uniform(k_h, (pop_size, num_patches)) * coeff_hue
    saturations = jax.random.uniform(k_s, (pop_size, num_patches)) * coeff_sat
    values = jax.random.uniform(k_v, (pop_size, num_patches)) * coeff_val
    orders = jax.random.uniform(k_o, (pop_size, num_patches))

    image = jax.random.uniform(
        k_img, (pop_size, num_patches, 5, H, W), dtype=jnp.float32)

    ref = _reference(image, hues, saturations, values, orders)

    out = population_colour_hsv_forward(image, hues, saturations, values, orders)
    out = jax.block_until_ready(out)

    assert out.shape == (pop_size, num_patches, 5, H, W)
    assert jnp.allclose(out.astype(jnp.float32), ref, atol=1e-5, rtol=1e-5), \
        "mismatch vs reference"

    print("KERNEL_OK")
</pallas_src>

<mosaic_0001>
module attributes {stable_mosaic.version = 11 : i64} {
  func.func @_hsv_colour_kernel(%arg0: i32, %arg1: memref<6x4xf32, #tpu.memory_space<vmem>>, %arg2: memref<6x1280xf32, #tpu.memory_space<vmem>>, %arg3: memref<6x1280xf32, #tpu.memory_space<vmem>>) attributes {dimension_semantics = [#tpu.dimension_semantics<parallel>], iteration_bounds = array<i64: 1>, scalar_prefetch = 0 : i64, scratch_operands = 0 : i64, tpu.core_type = #tpu.core_type<tc>, window_params = [{transform_indices = @transform_0, window_bounds = array<i64: 6, 4>}, {transform_indices = @transform_1, window_bounds = array<i64: 6, 1280>}, {transform_indices = @transform_2, window_bounds = array<i64: 6, 1280>}]} {
    %c0 = arith.constant 0 : index
    %c0_0 = arith.constant 0 : index
    %0 = vector.load %arg1[%c0, %c0_0] : memref<6x4xf32, #tpu.memory_space<vmem>>, vector<6x4xf32>
    %1 = vector.extract_strided_slice %0 {offsets = [0, 0], sizes = [6, 1], strides = [1, 1]} : vector<6x4xf32> to vector<6x1xf32>
    %cst = arith.constant 0.954929649 : f32
    %2 = vector.broadcast %cst : f32 to vector<6x1xf32>
    %3 = arith.mulf %1, %2 : vector<6x1xf32>
    %4 = vector.extract_strided_slice %0 {offsets = [0, 1], sizes = [6, 1], strides = [1, 1]} : vector<6x4xf32> to vector<6x1xf32>
    %5 = vector.extract_strided_slice %0 {offsets = [0, 2], sizes = [6, 1], strides = [1, 1]} : vector<6x4xf32> to vector<6x1xf32>
    %6 = vector.extract_strided_slice %0 {offsets = [0, 3], sizes = [6, 1], strides = [1, 1]} : vector<6x4xf32> to vector<6x1xf32>
    %c0_1 = arith.constant 0 : index
    %c0_2 = arith.constant 0 : index
    %7 = vector.load %arg2[%c0_1, %c0_2] : memref<6x1280xf32, #tpu.memory_space<vmem>>, vector<6x256xf32>
    %8 = vector.broadcast %3 : vector<6x1xf32> to vector<6x256xf32>
    %9 = arith.mulf %7, %8 : vector<6x256xf32>
    %c0_3 = arith.constant 0 : index
    %c256 = arith.constant 256 : index
    %10 = vector.load %arg2[%c0_3, %c256] : memref<6x1280xf32, #tpu.memory_space<vmem>>, vector<6x256xf32>
    %11 = vector.broadcast %4 : vector<6x1xf32> to vector<6x256xf32>
    %12 = arith.mulf %10, %11 : vector<6x256xf32>
    %c0_4 = arith.constant 0 : index
    %c512 = arith.constant 512 : index
    %13 = vector.load %arg2[%c0_4, %c512] : memref<6x1280xf32, #tpu.memory_space<vmem>>, vector<6x256xf32>
    %14 = vector.broadcast %5 : vector<6x1xf32> to vector<6x256xf32>
    %15 = arith.mulf %13, %14 : vector<6x256xf32>
    %16 = math.floor %9 : vector<6x256xf32>
    %cst_5 = arith.constant 6.000000e+00 : f32
    %17 = vector.broadcast %cst_5 : f32 to vector<6x256xf32>
    %18 = arith.remf %16, %17 : vector<6x256xf32>
    %cst_6 = arith.constant 0.000000e+00 : f32
    %19 = vector.broadcast %cst_6 : f32 to vector<6x256xf32>
    %20 = arith.cmpf one, %18, %19 : vector<6x256xf32>
    %cst_7 = arith.constant 0.000000e+00 : f32
    %21 = vector.broadcast %cst_7 : f32 to vector<6x256xf32>
    %22 = arith.cmpf olt, %18, %21 : vector<6x256xf32>
    %cst_8 = arith.constant 0.000000e+00 : f32
    %23 = arith.cmpf olt, %cst_5, %cst_8 : f32
    %24 = vector.broadcast %23 : i1 to vector<6x256xi1>
    %25 = vector.broadcast %24 : vector<6x256xi1> to vector<6x256xi1>
    %26 = arith.xori %22, %25 : vector<6x256xi1>
    %27 = arith.andi %26, %20 : vector<6x256xi1>
    %28 = vector.broadcast %cst_5 : f32 to vector<6x256xf32>
    %29 = arith.addf %18, %28 : vector<6x256xf32>
    %30 = arith.select %27, %29, %18 : vector<6x256xi1>, vector<6x256xf32>
    %cst_9 = arith.constant 6.000000e+00 : f32
    %31 = vector.broadcast %cst_9 : f32 to vector<6x256xf32>
    %32 = arith.remf %9, %31 : vector<6x256xf32>
    %cst_10 = arith.constant 0.000000e+00 : f32
    %33 = vector.broadcast %cst_10 : f32 to vector<6x256xf32>
    %34 = arith.cmpf one, %32, %33 : vector<6x256xf32>
    %cst_11 = arith.constant 0.000000e+00 : f32
    %35 = vector.broadcast %cst_11 : f32 to vector<6x256xf32>
    %36 = arith.cmpf olt, %32, %35 : vector<6x256xf32>
    %cst_12 = arith.constant 0.000000e+00 : f32
    %37 = arith.cmpf olt, %cst_9, %cst_12 : f32
    %38 = vector.broadcast %37 : i1 to vector<6x256xi1>
    %39 = vector.broadcast %38 : vector<6x256xi1> to vector<6x256xi1>
    %40 = arith.xori %36, %39 : vector<6x256xi1>
    %41 = arith.andi %40, %34 : vector<6x256xi1>
    %42 = vector.broadcast %cst_9 : f32 to vector<6x256xf32>
    %43 = arith.addf %32, %42 : vector<6x256xf32>
    %44 = arith.select %41, %43, %32 : vector<6x256xi1>, vector<6x256xf32>
    %45 = arith.subf %44, %30 : vector<6x256xf32>
    %46 = arith.fptosi %30 : vector<6x256xf32> to vector<6x256xi32>
    %cst_13 = arith.constant 1.000000e+00 : f32
    %47 = vector.broadcast %cst_13 : f32 to vector<6x256xf32>
    %48 = arith.subf %47, %12 : vector<6x256xf32>
    %49 = arith.mulf %15, %48 : vector<6x256xf32>
    %50 = arith.mulf %45, %12 : vector<6x256xf32>
    %cst_14 = arith.constant 1.000000e+00 : f32
    %51 = vector.broadcast %cst_14 : f32 to vector<6x256xf32>
    %52 = arith.subf %51, %50 : vector<6x256xf32>
    %53 = arith.mulf %15, %52 : vector<6x256xf32>
    %cst_15 = arith.constant 1.000000e+00 : f32
    %54 = vector.broadcast %cst_15 : f32 to vector<6x256xf32>
    %55 = arith.subf %54, %45 : vector<6x256xf32>
    %56 = arith.mulf %55, %12 : vector<6x256xf32>
    %cst_16 = arith.constant 1.000000e+00 : f32
    %57 = vector.broadcast %cst_16 : f32 to vector<6x256xf32>
    %58 = arith.subf %57, %56 : vector<6x256xf32>
    %59 = arith.mulf %15, %58 : vector<6x256xf32>
    %c0_i32 = arith.constant 0 : i32
    %60 = vector.broadcast %c0_i32 : i32 to vector<6x256xi32>
    %61 = arith.cmpi eq, %46, %60 : vector<6x256xi32>
    %c1_i32 = arith.constant 1 : i32
    %62 = vector.broadcast %c1_i32 : i32 to vector<6x256xi32>
    %63 = arith.cmpi eq, %46, %62 : vector<6x256xi32>
    %c2_i32 = arith.constant 2 : i32
    %64 = vector.broadcast %c2_i32 : i32 to vector<6x256xi32>
    %65 = arith.cmpi eq, %46, %64 : vector<6x256xi32>
    %c3_i32 = arith.constant 3 : i32
    %66 = vector.broadcast %c3_i32 : i32 to vector<6x256xi32>
    %67 = arith.cmpi eq, %46, %66 : vector<6x256xi32>
    %c4_i32 = arith.constant 4 : i32
    %68 = vector.broadcast %c4_i32 : i32 to vector<6x256xi32>
    %69 = arith.cmpi eq, %46, %68 : vector<6x256xi32>
    %70 = arith.select %69, %59, %15 : vector<6x256xi1>, vector<6x256xf32>
    %71 = arith.select %67, %49, %70 : vector<6x256xi1>, vector<6x256xf32>
    %72 = arith.select %65, %49, %71 : vector<6x256xi1>, vector<6x256xf32>
    %73 = arith.select %63, %53, %72 : vector<6x256xi1>, vector<6x256xf32>
    %74 = arith.select %61, %15, %73 : vector<6x256xi1>, vector<6x256xf32>
    %c0_17 = arith.constant 0 : index
    %c0_18 = arith.constant 0 : index
    %75 = vector.load %arg3[%c0_17, %c0_18] : memref<6x1280xf32, #tpu.memory_space<vmem>>, vector<6x256xf32>
    tpu.vector_store %arg3[%c0_17, %c0_18], %74 {strides = array<i32>} : memref<6x1280xf32, #tpu.memory_space<vmem>>, vector<6x256xf32>,
    %c0_i32_19 = arith.constant 0 : i32
    %76 = vector.broadcast %c0_i32_19 : i32 to vector<6x256xi32>
    %77 = arith.cmpi eq, %46, %76 : vector<6x256xi32>
    %c1_i32_20 = arith.constant 1 : i32
    %78 = vector.broadcast %c1_i32_20 : i32 to vector<6x256xi32>
    %79 = arith.cmpi eq, %46, %78 : vector<6x256xi32>
    %c2_i32_21 = arith.constant 2 : i32
    %80 = vector.broadcast %c2_i32_21 : i32 to vector<6x256xi32>
    %81 = arith.cmpi eq, %46, %80 : vector<6x256xi32>
    %c3_i32_22 = arith.constant 3 : i32
    %82 = vector.broadcast %c3_i32_22 : i32 to vector<6x256xi32>
    %83 = arith.cmpi eq, %46, %82 : vector<6x256xi32>
    %c4_i32_23 = arith.constant 4 : i32
    %84 = vector.broadcast %c4_i32_23 : i32 to vector<6x256xi32>
    %85 = arith.cmpi eq, %46, %84 : vector<6x256xi32>
    %86 = arith.select %85, %49, %49 : vector<6x256xi1>, vector<6x256xf32>
    %87 = arith.select %83, %53, %86 : vector<6x256xi1>, vector<6x256xf32>
    %88 = arith.select %81, %15, %87 : vector<6x256xi1>, vector<6x256xf32>
    %89 = arith.select %79, %15, %88 : vector<6x256xi1>, vector<6x256xf32>
    %90 = arith.select %77, %59, %89 : vector<6x256xi1>, vector<6x256xf32>
    %c0_24 = arith.constant 0 : index
    %c256_25 = arith.constant 256 : index
    %91 = vector.load %arg3[%c0_24, %c256_25] : memref<6x1280xf32, #tpu.memory_space<vmem>>, vector<6x256xf32>
    tpu.vector_store %arg3[%c0_24, %c256_25], %90 {strides = array<i32>} : memref<6x1280xf32, #tpu.memory_space<vmem>>, vector<6x256xf32>,
    %c0_i32_26 = arith.constant 0 : i32
    %92 = vector.broadcast %c0_i32_26 : i32 to vector<6x256xi32>
    %93 = arith.cmpi eq, %46, %92 : vector<6x256xi32>
    %c1_i32_27 = arith.constant 1 : i32
    %94 = vector.broadcast %c1_i32_27 : i32 to vector<6x256xi32>
    %95 = arith.cmpi eq, %46, %94 : vector<6x256xi32>
    %c2_i32_28 = arith.constant 2 : i32
    %96 = vector.broadcast %c2_i32_28 : i32 to vector<6x256xi32>
    %97 = arith.cmpi eq, %46, %96 : vector<6x256xi32>
    %c3_i32_29 = arith.constant 3 : i32
    %98 = vector.broadcast %c3_i32_29 : i32 to vector<6x256xi32>
    %99 = arith.cmpi eq, %46, %98 : vector<6x256xi32>
    %c4_i32_30 = arith.constant 4 : i32
    %100 = vector.broadcast %c4_i32_30 : i32 to vector<6x256xi32>
    %101 = arith.cmpi eq, %46, %100 : vector<6x256xi32>
    %102 = arith.select %101, %15, %53 : vector<6x256xi1>, vector<6x256xf32>
    %103 = arith.select %99, %15, %102 : vector<6x256xi1>, vector<6x256xf32>
    %104 = arith.select %97, %59, %103 : vector<6x256xi1>, vector<6x256xf32>
    %105 = arith.select %95, %49, %104 : vector<6x256xi1>, vector<6x256xf32>
    %106 = arith.select %93, %49, %105 : vector<6x256xi1>, vector<6x256xf32>
    %c0_31 = arith.constant 0 : index
    %c512_32 = arith.constant 512 : index
    %107 = vector.load %arg3[%c0_31, %c512_32] : memref<6x1280xf32, #tpu.memory_space<vmem>>, vector<6x256xf32>
    tpu.vector_store %arg3[%c0_31, %c512_32], %106 {strides = array<i32>} : memref<6x1280xf32, #tpu.memory_space<vmem>>, vector<6x256xf32>,
    %c0_33 = arith.constant 0 : index
    %c768 = arith.constant 768 : index
    %108 = vector.load %arg2[%c0_33, %c768] : memref<6x1280xf32, #tpu.memory_space<vmem>>, vector<6x256xf32>
    %c0_34 = arith.constant 0 : index
    %c768_35 = arith.constant 768 : index
    %109 = vector.load %arg3[%c0_34, %c768_35] : memref<6x1280xf32, #tpu.memory_space<vmem>>, vector<6x256xf32>
    tpu.vector_store %arg3[%c0_34, %c768_35], %108 {strides = array<i32>} : memref<6x1280xf32, #tpu.memory_space<vmem>>, vector<6x256xf32>,
    %c0_36 = arith.constant 0 : index
    %c1024 = arith.constant 1024 : index
    %110 = vector.load %arg2[%c0_36, %c1024] : memref<6x1280xf32, #tpu.memory_space<vmem>>, vector<6x256xf32>
    %111 = vector.broadcast %6 : vector<6x1xf32> to vector<6x256xf32>
    %112 = arith.mulf %110, %111 : vector<6x256xf32>
    %c0_37 = arith.constant 0 : index
    %c1024_38 = arith.constant 1024 : index
    %113 = vector.load %arg3[%c0_37, %c1024_38] : memref<6x1280xf32, #tpu.memory_space<vmem>>, vector<6x256xf32>
    tpu.vector_store %arg3[%c0_37, %c1024_38], %112 {strides = array<i32>} : memref<6x1280xf32, #tpu.memory_space<vmem>>, vector<6x256xf32>,
    return
  }
  func.func @transform_0(%arg0: i32) -> (i32, i32) {
    %c0_i32 = arith.constant 0 : i32
    %c0_i32_0 = arith.constant 0 : i32
    return %arg0, %c0_i32 : i32, i32
  }
  func.func @transform_1(%arg0: i32) -> (i32, i32) {
    %c0_i32 = arith.constant 0 : i32
    %c0_i32_0 = arith.constant 0 : i32
    return %arg0, %c0_i32 : i32, i32
  }
  func.func @transform_2(%arg0: i32) -> (i32, i32) {
    %c0_i32 = arith.constant 0 : i32
    %c0_i32_0 = arith.constant 0 : i32
    return %arg0, %c0_i32 : i32, i32
  }
}

</mosaic_0001>

<bundles_post_ra>
// kernel: tpu_custom_call.1
= control target key start
LH: loop header
LB: loop body
LE: loop exit
PB: predicated region body
PF: predicated region fallthrough
CT: control target
= control target key end

     0   :  { %7 = vsyncpa [#allocation3], 0  ;;  %s375_s0 = inlined_call_operand.vmem [shape: f32[6,4], index: 0, kind: input, shape index: {}]   ;;  %s376_s1 = inlined_call_operand.hbm [shape: f32[6,1280], index: 1, kind: input, shape index: {}]   ;;  %s377_s2 = inlined_call_operand.hbm [shape: f32[6,1280], index: 2, kind: output, shape index: {}]  }
   0x1   :  { %8 = vsyncpa [#allocation4], 0  ;;  %s276_s9 = smov [#allocation2]   ;;  %s228_s13 = scalar_lea.hbm %s376_s1, 1280 }
   0x2   :  { %s17_s10 = sshll.u32 %s276_s9, 4  ;;  %p229_p0 = scmp.ne.s32.totalorder %s376_s1, %s228_s13  ;;  %s18_s10 = int_to_ptr.vmem [resolvable:$true] %s17_s10 }
   0x3   :  { %p232_p1 = scmp.lt.u32.totalorder %s228_s13, %s376_s1 }
   0x5   :  { %p234_p2 = pnand %p232_p1, %p229_p0 }
   0x7   :  { %237 = shalt.err (!%p234_p2)
}
   0x8   :  { %s238_s18 = scalar_lea.vmem %s18_s10, 1280  ;;  %p243_p4 = scmp.lt.s32.totalorder %s18_s10, %s18_s10 }
   0x9   :  { %p239_p3 = scmp.ne.s32.totalorder %s18_s10, %s238_s18  ;;  %p244_p5 = scmp.lt.s32.totalorder %s238_s18, %s238_s18 }
   0xb   :  { %p245_p6 = por %p244_p5, %p243_p4 }
   0xd   :  { %p246_p7 = pnand %p245_p6, %p239_p3 }
   0xf   :  { %249 = shalt.err (!%p246_p7)
}
  0x10   :  { %20 = dma.hbm_to_vmem [thread:$0]  %s376_s1, 1280, %s18_s10, [#allocation3]  }
  0x11   :  { %272 = dma.done.wait [#allocation3], 1280  }
  0x12   :  { %273 = vsyncadd [#allocation3], 4294966016  ;;  %v277_v0 = vmov 0   ;;  %v278_v1 = vmov 2   ;;  %v24_v2 = vld [vmem:[%s375_s0] sm:$0x3f] }
  0x13   :  { %223 = vset.pattern.permute.xlu0 %v277_v0  ;;  %225 = vset.pattern.permute.xlu1 %v278_v1  ;;  %v25_v3 = vmul.f32 0.95492965, %v24_v2  ;;  %v279_v4 = vmov 3   ;;  %v280_v5 = vmov 1   ;;  %v184_v6 = vld [vmem:[#allocation2 + $0x30] sm:$0x3f] }
  0x14   :  { %47 = vperm.xlu1 %225, %v24_v2   ;;  %v185_v7 = vld [vmem:[#allocation2 + $0x38] sm:$0x3f]  ;;  %186 = vst [vmem:[#allocation5 + $0x30] sm:$0x3f] %v184_v6  ;;  %v26_v8 = vld [vmem:[#allocation2] sm:$0x3f] }
  0x15   :  { %30 = vperm.xlu0 %223, %v25_v3   ;;  %187 = vst [vmem:[#allocation5 + $0x38] sm:$0x3f] %v185_v7  ;;  %v27_v9 = vld [vmem:[#allocation2 + $0x8] sm:$0x3f]  ;;  %v188_v14 = vld [vmem:[#allocation2 + $0x40] sm:$0x3f] }
  0x16   :  { %v189_v15 = vld [vmem:[#allocation2 + $0x48] sm:$0x3f]  ;;  %v35_v57 = vld [vmem:[#allocation2 + $0x10] sm:$0x3f]  ;;  %v44_v59 = vld [vmem:[#allocation2 + $0x20] sm:$0x3f] }
  0x17   :  { %v36_v60 = vld [vmem:[#allocation2 + $0x18] sm:$0x3f]  ;;  %v45_v3 = vld [vmem:[#allocation2 + $0x28] sm:$0x3f]  ;;  %s281_s0 = smov [#allocation5]  }
  0x18   :  { %226 = vset.pattern.permute.xlu1 %v279_v4  ;;  %s204_s1 = sshll.u32 %s281_s0, 4  ;;  %s205_s1 = int_to_ptr.vmem [resolvable:$true] %s204_s1 }
  0x19   :  { %191 = vperm.xlu1 %226, %v24_v2   ;;  %224 = vset.pattern.permute.xlu0 %v280_v5  ;;  %s250_s23 = scalar_lea.vmem %s205_s1, 1280  ;;  %p255_p9 = scmp.lt.s32.totalorder %s205_s1, %s205_s1 }
  0x1a   :  { %39 = vperm.xlu0 %224, %v24_v2   ;;  %p251_p8 = scmp.ne.s32.totalorder %s205_s1, %s250_s23  ;;  %p256_p10 = scmp.lt.s32.totalorder %s250_s23, %s250_s23 }
  0x1c   :  { %p257_p11 = por %p256_p10, %p255_p9 }
  0x1e   :  { %227 = vset.pattern.permute.xlu0 %v279_v4  ;;  %p258_p12 = pnand %p257_p11, %p251_p8 }
  0x93   :  { %v312_v10 = vpop.permute.xlu1 %47 }
  0x94   :  { %v31_v11 = vpop.permute.xlu0 %30  ;;  %v319_v4 = vmul.f32 %v312_v10, %v44_v59 }
  0x95   :  { %v33_v12 = vmul.f32 %v31_v11, %v26_v8  ;;  %v34_v13 = vmul.f32 %v31_v11, %v27_v9 }
  0x97   :  { %v52_v16 = vfloor.f32 %v33_v12  ;;  %v53_v17 = vfloor.f32 %v34_v13  ;;  %v86_v18 = vand.u32 2147483647, %v33_v12  ;;  %v97_v20 = vand.u32 2147483647, %v34_v13 }
  0x98   :  { %v192_v19 = vpop.permute.xlu1 %191  ;;  %v95_v41 = vand.u32 2147483648, %v33_v12  ;;  %v106_v42 = vand.u32 2147483648, %v34_v13 }
  0x99   :  { %v194_v21 = vmul.f32 %v192_v19, %v188_v14  ;;  %v195_v22 = vmul.f32 %v192_v19, %v189_v15  ;;  %v54_v23 = vand.u32 2147483647, %v52_v16  ;;  %v65_v24 = vand.u32 2147483647, %v53_v17  ;;  %v40_v58 = vpop.permute.xlu0 %39 }
  0x9a   :  { %v88_v25 = vmul.f32 0.16666667, %v86_v18  ;;  %v99_v26 = vmul.f32 0.16666667, %v97_v20  ;;  %v63_v50 = vand.u32 2147483648, %v52_v16  ;;  %v74_v52 = vand.u32 2147483648, %v53_v17 }
  0x9b   :  { %196 = vst [vmem:[#allocation5 + $0x40] sm:$0x3f] %v194_v21  ;;  %197 = vst [vmem:[#allocation5 + $0x48] sm:$0x3f] %v195_v22  ;;  %v56_v27 = vmul.f32 0.16666667, %v54_v23  ;;  %v42_v2 = vmul.f32 %v40_v58, %v35_v57  ;;  %v43_v8 = vmul.f32 %v40_v58, %v36_v60  ;;  %v51_v17 = vmul.f32 %v312_v10, %v45_v3 }
  0x9c   :  { %v67_v28 = vmul.f32 0.16666667, %v65_v24  ;;  %v89_v29 = vfloor.f32 %v88_v25  ;;  %v100_v30 = vfloor.f32 %v99_v26 }
  0x9d   :  { %v57_v31 = vfloor.f32 %v56_v27  ;;  %v122_v15 = vsub.f32 1.0, %v42_v2  ;;  %v123_v16 = vsub.f32 1.0, %v43_v8 }
  0x9e   :  { %v68_v32 = vfloor.f32 %v67_v28  ;;  %v90_v33 = vmul.f32 6.0, %v89_v29  ;;  %v101_v34 = vmul.f32 6.0, %v100_v30 }
  0x9f   :  { %v58_v35 = vmul.f32 6.0, %v57_v31  ;;  %v125_v25 = vmul.f32 %v123_v16, %v51_v17 }
  0xa0   :  { %v69_v36 = vmul.f32 6.0, %v68_v32  ;;  %v91_v37 = vsub.f32 %v86_v18, %v90_v33  ;;  %v102_v38 = vsub.f32 %v97_v20, %v101_v34 }
  0xa1   :  { %v59_v39 = vsub.f32 %v54_v23, %v58_v35 }
  0xa2   :  { %v70_v40 = vsub.f32 %v65_v24, %v69_v36  ;;  %vm92_vm0 = vcmp.eq.f32.partialorder %v91_v37, 6.0  ;;  %vm103_vm1 = vcmp.eq.f32.partialorder %v102_v38, 6.0  ;;  %v124_v24 = vmul.f32 %v122_v15, %v319_v4 }
  0xa3   :  { %vm60_vm2 = vcmp.eq.f32.partialorder %v59_v39, 6.0  ;;  %v93_v43 = vsel %vm92_vm0, 0.0, %v91_v37  ;;  %v104_v44 = vsel %vm103_vm1, 0.0, %v102_v38 }
  0xa4   :  { %vm71_vm3 = vcmp.eq.f32.partialorder %v70_v40, 6.0  ;;  %v61_v45 = vsel %vm60_vm2, 0.0, %v59_v39  ;;  %v94_v47 = vand.u32 2147483647, %v93_v43  ;;  %v105_v48 = vand.u32 2147483647, %v104_v44 }
  0xa5   :  { %v72_v46 = vsel %vm71_vm3, 0.0, %v70_v40  ;;  %v62_v49 = vand.u32 2147483647, %v61_v45 }
  0xa6   :  { %v73_v51 = vand.u32 2147483647, %v72_v46  ;;  %v96_v53 = vor.u32 %v95_v41, %v94_v47  ;;  %v107_v54 = vor.u32 %v106_v42, %v105_v48 }
  0xa7   :  { %v64_v55 = vor.u32 %v63_v50, %v62_v49 }
  0xa8   :  { %v75_v56 = vor.u32 %v74_v52, %v73_v51  ;;  %vm108_vm4 = vcmp.ne.f32.partialorder %v96_v53, 0.0  ;;  %vm109_vm5 = vcmp.ne.f32.partialorder %v107_v54, 0.0  ;;  %vm110_vm6 = vcmp.lt.f32.partialorder %v96_v53, 0.0 }
  0xa9   :  { %vm111_vm7 = vcmp.lt.f32.partialorder %v107_v54, 0.0  ;;  %vm76_vm8 = vcmp.ne.f32.partialorder %v64_v55, 0.0  ;;  %vm78_vm10 = vcmp.lt.f32.partialorder %v64_v55, 0.0  ;;  %vm314_vm12 = vmand %vm110_vm6, %vm108_vm4  ;;  %v82_v62 = vadd.f32 6.0, %v64_v55 }
  0xaa   :  { %vm77_vm9 = vcmp.ne.f32.partialorder %v75_v56, 0.0  ;;  %vm79_vm11 = vcmp.lt.f32.partialorder %v75_v56, 0.0  ;;  %vm80_vm13 = vmand %vm78_vm10, %vm76_vm8  ;;  %v83_v63 = vadd.f32 6.0, %v75_v56  ;;  %v114_v0 = vadd.f32 6.0, %v96_v53 }
  0xab   :  { %v115_v1 = vadd.f32 6.0, %v107_v54  ;;  %vm81_vm14 = vmand %vm79_vm11, %vm77_vm9  ;;  %v84_v5 = vsel %vm80_vm13, %v82_v62, %v64_v55 }
  0xac   :  { %v85_v6 = vsel %vm81_vm14, %v83_v63, %v75_v56  ;;  %vm113_vm15 = vmand %vm111_vm7, %vm109_vm5  ;;  %v116_v7 = vsel %vm314_vm12, %v114_v0, %v96_v53  ;;  %v213_v12 = vtrunc.f32 %v84_v5 }
  0xad   :  { %v117_v9 = vsel %vm113_vm15, %v115_v1, %v107_v54  ;;  %v118_v11 = vsub.f32 %v116_v7, %v84_v5  ;;  %v215_v13 = vtrunc.f32 %v85_v6 }
  0xae   :  { %v119_v14 = vsub.f32 %v117_v9, %v85_v6  ;;  %v214_v18 = vcvt.f32.s32 %v213_v12 }
  0xaf   :  { %v216_v19 = vcvt.f32.s32 %v215_v13  ;;  %v126_v20 = vmul.f32 %v118_v11, %v42_v2  ;;  %v132_v21 = vsub.f32 1.0, %v118_v11 }
  0xb0   :  { %v133_v22 = vsub.f32 1.0, %v119_v14  ;;  %v127_v23 = vmul.f32 %v119_v14, %v43_v8  ;;  %vm140_vm0 = vcmp.eq.s32.totalorder %v214_v18, 0  ;;  %vm142_vm2 = vcmp.eq.s32.totalorder %v214_v18, 1 }
  0xb1   :  { %vm141_vm1 = vcmp.eq.s32.totalorder %v216_v19, 0  ;;  %v128_v26 = vsub.f32 1.0, %v126_v20  ;;  %vm143_vm3 = vcmp.eq.s32.totalorder %v216_v19, 1  ;;  %v134_v28 = vmul.f32 %v132_v21, %v42_v2 }
  0xb2   :  { %v129_v27 = vsub.f32 1.0, %v127_v23  ;;  %v135_v29 = vmul.f32 %v133_v22, %v43_v8  ;;  %vm146_vm4 = vcmp.eq.s32.totalorder %v214_v18, 3  ;;  %vm147_vm5 = vcmp.eq.s32.totalorder %v216_v19, 3 }
  0xb3   :  { %v130_v10 = vmul.f32 %v128_v26, %v319_v4  ;;  %vm148_vm6 = vcmp.eq.s32.totalorder %v214_v18, 4  ;;  %vm149_vm7 = vcmp.eq.s32.totalorder %v216_v19, 4  ;;  %v136_v31 = vsub.f32 1.0, %v134_v28 }
  0xb4   :  { %v131_v30 = vmul.f32 %v129_v27, %v51_v17  ;;  %v137_v32 = vsub.f32 1.0, %v135_v29  ;;  %vm144_vm8 = vcmp.eq.s32.totalorder %v214_v18, 2  ;;  %vm145_vm9 = vcmp.eq.s32.totalorder %v216_v19, 2 }
  0xb5   :  { %v172_v33 = vsel %vm148_vm6, %v319_v4, %v130_v10  ;;  %v162_v35 = vsel %vm146_vm4, %v130_v10, %v124_v24  ;;  %v138_v37 = vmul.f32 %v136_v31, %v319_v4 }
  0xb6   :  { %v173_v34 = vsel %vm149_vm7, %v51_v17, %v131_v30  ;;  %v163_v36 = vsel %vm147_vm5, %v131_v30, %v125_v25  ;;  %v139_v38 = vmul.f32 %v137_v32, %v51_v17  ;;  %v174_v39 = vsel %vm146_vm4, %v319_v4, %v172_v33 }
  0xb7   :  { %v175_v40 = vsel %vm147_vm5, %v51_v17, %v173_v34  ;;  %v164_v41 = vsel %vm144_vm8, %v319_v4, %v162_v35  ;;  %v165_v42 = vsel %vm145_vm9, %v51_v17, %v163_v36  ;;  %v150_v43 = vsel %vm148_vm6, %v138_v37, %v319_v4 }
  0xb8   :  { %v151_v44 = vsel %vm149_vm7, %v139_v38, %v51_v17  ;;  %v166_v45 = vsel %vm142_vm2, %v319_v4, %v164_v41  ;;  %v167_v46 = vsel %vm143_vm3, %v51_v17, %v165_v42  ;;  %v152_v47 = vsel %vm146_vm4, %v124_v24, %v150_v43 }
  0xb9   :  { %v153_v48 = vsel %vm147_vm5, %v125_v25, %v151_v44  ;;  %v168_v49 = vsel %vm140_vm0, %v138_v37, %v166_v45  ;;  %v169_v50 = vsel %vm141_vm1, %v139_v38, %v167_v46  ;;  %v154_v51 = vsel %vm144_vm8, %v124_v24, %v152_v47 }
  0xba   :  { %v155_v52 = vsel %vm145_vm9, %v125_v25, %v153_v48  ;;  %170 = vst [vmem:[#allocation5 + $0x10] sm:$0x3f] %v168_v49  ;;  %171 = vst [vmem:[#allocation5 + $0x18] sm:$0x3f] %v169_v50  ;;  %v176_v53 = vsel %vm144_vm8, %v138_v37, %v174_v39  ;;  %v177_v54 = vsel %vm145_vm9, %v139_v38, %v175_v40 }
  0xbb   :  { %v156_v55 = vsel %vm142_vm2, %v130_v10, %v154_v51  ;;  %v157_v56 = vsel %vm143_vm3, %v131_v30, %v155_v52  ;;  %v178_v57 = vsel %vm142_vm2, %v124_v24, %v176_v53  ;;  %v179_v58 = vsel %vm143_vm3, %v125_v25, %v177_v54 }
  0xbc   :  { %v158_v59 = vsel %vm140_vm0, %v319_v4, %v156_v55  ;;  %v159_v60 = vsel %vm141_vm1, %v51_v17, %v157_v56  ;;  %v180_v61 = vsel %vm140_vm0, %v124_v24, %v178_v57  ;;  %v181_v62 = vsel %vm141_vm1, %v125_v25, %v179_v58 }
  0xbd   :  { %160 = vst [vmem:[#allocation5] sm:$0x3f] %v158_v59  ;;  %161 = vst [vmem:[#allocation5 + $0x8] sm:$0x3f] %v159_v60 }
  0xbe   :  { %182 = vst [vmem:[#allocation5 + $0x20] sm:$0x3f] %v180_v61  ;;  %183 = vst [vmem:[#allocation5 + $0x28] sm:$0x3f] %v181_v62 }
  0xbf   :  { %261 = shalt.err (!%p258_p12)
}
  0xc0   :  { %s262_s26 = scalar_lea.hbm %s377_s2, 1280 }
  0xc1   :  { %p263_p13 = scmp.ne.s32.totalorder %s377_s2, %s262_s26  ;;  %p266_p0 = scmp.lt.u32.totalorder %s262_s26, %s377_s2 }
  0xc3   :  { %p268_p1 = pnand %p266_p0, %p263_p13 }
  0xc5   :  { %271 = shalt.err (!%p268_p1)
}
  0xc6   :  { %207 = dma.vmem_to_hbm [thread:$0]  %s205_s1, 1280, %s377_s2, [#allocation4]  }
  0xc7   :  { %274 = dma.done.wait [#allocation4], 1280  }
  0xc8   :  { %275 = vsyncadd [#allocation4], 4294966016 }
  0xc9   :  { %211 = vsyncpa [#allocation3], 1 }
  0xca   :  { %212 = vsyncpa [#allocation4], 1 }

</bundles_post_ra>
